<compile_context>
chip_gen: v7x
topology: tpu7x:2x2x1
jax: 0.10.0
libtpu: 0.0.40
codegen_flags: <defaults>
</compile_context>

<pallas_src>
import jax
import jax.numpy as jnp
from jax.experimental import pallas as pl
from jax.experimental.pallas import tpu as pltpu

_VMEM_LIMIT = 48 * 1024 * 1024  # above the 32 MiB default, below v7x's 64 MiB


# ---------------------------------------------------------------------------
# Kernel 1: bulk input projection  xp = x @ Wi_cat + bi_cat  (MXU-friendly GEMM)
# ---------------------------------------------------------------------------
def _input_proj_kernel(x_ref, w_ref, b_ref, o_ref):
    x = x_ref[...].astype(w_ref.dtype)          # bf16 operand for the MXU
    o_ref[...] = (jnp.dot(x, w_ref[...], preferred_element_type=jnp.float32)
                  + b_ref[...])


def input_proj_pallas(x2d, wi_cat, bi_cat, *, row_tile=256):
    """x2d: [M, H] f32, wi_cat: [H, 3H] bf16, bi_cat: [1, 3H] f32 -> [M, 3H] f32."""
    M, H = x2d.shape
    N = wi_cat.shape[1]
    tm = M if M <= row_tile else row_tile
    return pl.pallas_call(
        _input_proj_kernel,
        out_shape=jax.ShapeDtypeStruct((M, N), jnp.float32),
        grid_spec=pltpu.PrefetchScalarGridSpec(
            num_scalar_prefetch=0,
            grid=(pl.cdiv(M, tm),),
            in_specs=[
                pl.BlockSpec((tm, H), lambda i: (i, 0)),   # x row tile
                pl.BlockSpec((H, N), lambda i: (0, 0)),    # fused weight (invariant)
                pl.BlockSpec((1, N), lambda i: (0, 0)),    # fused bias (invariant)
            ],
            out_specs=pl.BlockSpec((tm, N), lambda i: (i, 0)),
        ),
        compiler_params=pltpu.CompilerParams(
            dimension_semantics=("parallel",),   # independent rows -> megacore
            vmem_limit_bytes=_VMEM_LIMIT),
    )(x2d, wi_cat, bi_cat)


# ---------------------------------------------------------------------------
# Kernel 2: GRU recurrence (the sequential hot path)
# ---------------------------------------------------------------------------
def _gru_recurrence_kernel(xp_ref, wh_ref, bh_ref, h0_ref, out_ref, h_scratch):
    """One chunk of time steps of the GRU recurrence.

    xp_ref : (TC, B, 3H) f32  precomputed x@Wi + bi, gate order (r, z, n)
    wh_ref : (H, 3H)     bf16 fused hidden->hidden weight
    bh_ref : (1, 3H)     f32  fused hidden biases
    h0_ref : (B, H)      f32  initial hidden (used on chunk 0 only)
    out_ref: (TC, B, H)  f32  per-step hidden outputs
    h_scratch: (B, H) f32 VMEM scratch carrying h_{t-1} across chunks
    """
    H = wh_ref.shape[0]
    tc = xp_ref.shape[0]

    @pl.when(pl.program_id(0) == 0)
    def _():
        h_scratch[...] = h0_ref[...]

    wh = wh_ref[...]
    bh = bh_ref[...]

    def step(s, h):
        # Single fused (B,H)x(H,3H) MXU matmul per step (bf16 in, f32 acc).
        gh = jnp.dot(h.astype(wh.dtype), wh,
                     preferred_element_type=jnp.float32) + bh
        xp = xp_ref[s]                                  # (B, 3H)
        r = jax.nn.sigmoid(xp[:, 0:H] + gh[:, 0:H])
        z = jax.nn.sigmoid(xp[:, H:2 * H] + gh[:, H:2 * H])
        # bi_n lives in xp, bh_n in gh -> n = tanh(i_n + bi_n + r*(h_n + bh_n))
        n = jnp.tanh(xp[:, 2 * H:3 * H] + r * gh[:, 2 * H:3 * H])
        h_new = (1.0 - z) * n + z * h
        out_ref[s] = h_new                              # VMEM store; HBM writeback per chunk
        return h_new

    h_last = jax.lax.fori_loop(0, tc, step, h_scratch[...], unroll=True)
    h_scratch[...] = h_last


def _pick_time_chunk(T, max_chunk=16):
    if T <= max_chunk:
        return T
    for c in range(max_chunk, 0, -1):
        if T % c == 0:
            return c
    return 1


def gru_recurrence_pallas(xp, wh_cat, bh_cat, h0, *, max_chunk=16):
    """xp: [T, B, 3H] f32 -> hidden outputs [T, B, H] f32."""
    T, B, H3 = xp.shape
    H = H3 // 3
    tc = _pick_time_chunk(T, max_chunk)
    return pl.pallas_call(
        _gru_recurrence_kernel,
        out_shape=jax.ShapeDtypeStruct((T, B, H), jnp.float32),
        grid_spec=pltpu.PrefetchScalarGridSpec(
            num_scalar_prefetch=0,
            grid=(T // tc,),
            in_specs=[
                pl.BlockSpec((tc, B, H3), lambda c: (c, 0, 0)),  # xp chunk
                pl.BlockSpec((H, H3), lambda c: (0, 0)),         # Wh (resident)
                pl.BlockSpec((1, H3), lambda c: (0, 0)),         # bh
                pl.BlockSpec((B, H), lambda c: (0, 0)),          # h0
            ],
            out_specs=pl.BlockSpec((tc, B, H), lambda c: (c, 0, 0)),
            scratch_shapes=[pltpu.VMEM((B, H), jnp.float32)],
        ),
        compiler_params=pltpu.CompilerParams(
            dimension_semantics=("arbitrary",),   # recurrence -> sequential
            vmem_limit_bytes=_VMEM_LIMIT),
    )(xp, wh_cat, bh_cat, h0)


# ---------------------------------------------------------------------------
# Encoder module
# ---------------------------------------------------------------------------
class EncoderPallas:
    """JAX/Pallas equivalent of the PyTorch Encoder (embedding + n-layer GRU)."""

    def __init__(self, hidden_size, source_vocab_size, n_layers=2, key=None,
                 param_dtype=jnp.bfloat16):
        self.hidden_size = hidden_size
        self.vocab_size = source_vocab_size
        self.n_layers = n_layers
        if key is None:
            key = jax.random.PRNGKey(0)
        keys = jax.random.split(key, 1 + 4 * n_layers)
        H = hidden_size
        bound = 1.0 / float(H) ** 0.5
        # Embedding table [V, H] (lookup stays XLA glue).
        self.embedding = jax.random.normal(keys[0], (source_vocab_size, H),
                                           dtype=jnp.float32)
        self.layers = []
        for l in range(n_layers):
            k_wi, k_wh, k_bi, k_bh = keys[1 + 4 * l: 1 + 4 * (l + 1)]
            # Fused, pre-transposed weights: columns = (r, z, n) gate blocks.
            wi = jax.random.uniform(k_wi, (H, 3 * H), jnp.float32,
                                    -bound, bound).astype(param_dtype)
            wh = jax.random.uniform(k_wh, (H, 3 * H), jnp.float32,
                                    -bound, bound).astype(param_dtype)
            bi = jax.random.uniform(k_bi, (1, 3 * H), jnp.float32, -bound, bound)
            bh = jax.random.uniform(k_bh, (1, 3 * H), jnp.float32, -bound, bound)
            self.layers.append((wi, wh, bi, bh))

    def __call__(self, source_variable, h0=None):
        """source_variable: int tokens [T, B] (time-major). Returns (outputs, hidden)."""
        T, B = source_variable.shape
        H = self.hidden_size
        # TODO(synk): the embedding gather could be fused into the first
        # input-projection kernel via scalar prefetch + pl.Element row gather;
        # kept as XLA glue here.
        x = jnp.take(self.embedding, source_variable, axis=0)   # [T, B, H] f32
        # Pad batch to a sublane multiple so gate tiles / stores are unmasked.
        Bp = max(8, ((B + 7) // 8) * 8)
        if Bp != B:
            x = jnp.pad(x, ((0, 0), (0, Bp - B), (0, 0)))
        if h0 is None:
            h0 = jnp.zeros((self.n_layers, Bp, H), jnp.float32)
        elif h0.shape[1] != Bp:
            h0 = jnp.pad(h0, ((0, 0), (0, Bp - h0.shape[1]), (0, 0)))
        outputs = x
        finals = []
        for l, (wi, wh, bi, bh) in enumerate(self.layers):
            xp = input_proj_pallas(outputs.reshape(T * Bp, H), wi, bi)
            xp = xp.reshape(T, Bp, 3 * H)
            outputs = gru_recurrence_pallas(xp, wh, bh, h0[l])
            finals.append(outputs[-1])
        hidden = jnp.stack(finals, axis=0)[:, :B, :]
        return outputs[:, :B, :], hidden


# ------------- pure-JAX reference (same bf16 weights, f32 accumulation) -----
def _gru_layer_ref(x, wi_cat, wh_cat, bi_cat, bh_cat, h0):
    T, B, H = x.shape
    xp = (jnp.dot(x.astype(wi_cat.dtype), wi_cat,
                  preferred_element_type=jnp.float32) + bi_cat)   # [T, B, 3H]

    def step(h, xp_t):
        gh = (jnp.dot(h.astype(wh_cat.dtype), wh_cat,
                      preferred_element_type=jnp.float32) + bh_cat)
        r = jax.nn.sigmoid(xp_t[:, 0:H] + gh[:, 0:H])
        z = jax.nn.sigmoid(xp_t[:, H:2 * H] + gh[:, H:2 * H])
        n = jnp.tanh(xp_t[:, 2 * H:3 * H] + r * gh[:, 2 * H:3 * H])
        h_new = (1.0 - z) * n + z * h
        return h_new, h_new

    _, ys = jax.lax.scan(step, h0, xp)
    return ys


if __name__ == "__main__":
    # Small shapes consistent with the module: seq=8, batch=2, hidden=32, vocab=50.
    T, B, H, V, L = 8, 2, 32, 50, 2

    key = jax.random.PRNGKey(0)
    k_tok, k_params = jax.random.split(key)
    tokens = jax.random.randint(k_tok, (T, B), 0, V, dtype=jnp.int32)

    enc = EncoderPallas(hidden_size=H, source_vocab_size=V, n_layers=L,
                        key=k_params)

    outputs, hidden = enc(tokens)
    outputs = jax.block_until_ready(outputs)
    hidden = jax.block_until_ready(hidden)

    assert outputs.shape == (T, B, H)
    assert hidden.shape == (L, B, H)

    # Verify against a pure-JAX reference using the same bf16 weights.
    x = jnp.take(enc.embedding, tokens, axis=0)
    ref = x
    ref_finals = []
    for (wi, wh, bi, bh) in enc.layers:
        ref = _gru_layer_ref(ref, wi, wh, bi, bh, jnp.zeros((B, H), jnp.float32))
        ref_finals.append(ref[-1])
    ref_hidden = jnp.stack(ref_finals, axis=0)

    assert jnp.allclose(outputs, ref, atol=5e-3, rtol=5e-3), \
        float(jnp.max(jnp.abs(outputs - ref)))
    assert jnp.allclose(hidden, ref_hidden, atol=5e-3, rtol=5e-3)

    print("KERNEL_OK")
</pallas_src>

<mosaic_0001>
module attributes {stable_mosaic.version = 11 : i64} {
  func.func @_input_proj_kernel(%arg0: i32, %arg1: memref<64x32xf32, #tpu.memory_space<vmem>>, %arg2: memref<32x96xbf16, #tpu.memory_space<vmem>>, %arg3: memref<1x96xf32, #tpu.memory_space<vmem>>, %arg4: memref<64x96xf32, #tpu.memory_space<vmem>>) attributes {dimension_semantics = [#tpu.dimension_semantics<parallel>], iteration_bounds = array<i64: 1>, scalar_prefetch = 0 : i64, scratch_operands = 0 : i64, tpu.core_type = #tpu.core_type<tc>, window_params = [{transform_indices = @transform_0, window_bounds = array<i64: 64, 32>}, {pipeline_mode = #tpu.pipeline_mode<synchronous>, transform_indices = @transform_1, window_bounds = array<i64: 32, 96>}, {pipeline_mode = #tpu.pipeline_mode<synchronous>, transform_indices = @transform_2, window_bounds = array<i64: 1, 96>}, {transform_indices = @transform_3, window_bounds = array<i64: 64, 96>}]} {
    %c0 = arith.constant 0 : index
    %c0_0 = arith.constant 0 : index
    %0 = vector.load %arg1[%c0, %c0_0] : memref<64x32xf32, #tpu.memory_space<vmem>>, vector<64x32xf32>
    %1 = arith.truncf %0 : vector<64x32xf32> to vector<64x32xbf16>
    %c0_1 = arith.constant 0 : index
    %c0_2 = arith.constant 0 : index
    %2 = vector.load %arg2[%c0_1, %c0_2] : memref<32x96xbf16, #tpu.memory_space<vmem>>, vector<32x96xbf16>
    %cst = arith.constant dense<0.000000e+00> : vector<64x96xf32>
    %3 = tpu.matmul %1, %2, %cst {dimension_numbers = #tpu.dot_dimension_numbers<[1], [0], [0], [1], [0, 0, 1, 1], [], []>} : vector<64x32xbf16>, vector<32x96xbf16>, vector<64x96xf32> -> vector<64x96xf32>
    %c0_3 = arith.constant 0 : index
    %c0_4 = arith.constant 0 : index
    %4 = vector.load %arg3[%c0_3, %c0_4] : memref<1x96xf32, #tpu.memory_space<vmem>>, vector<1x96xf32>
    %5 = vector.broadcast %4 : vector<1x96xf32> to vector<64x96xf32>
    %6 = arith.addf %3, %5 : vector<64x96xf32>
    %c0_5 = arith.constant 0 : index
    %c0_6 = arith.constant 0 : index
    %7 = vector.load %arg4[%c0_5, %c0_6] : memref<64x96xf32, #tpu.memory_space<vmem>>, vector<64x96xf32>
    tpu.vector_store %arg4[%c0_5, %c0_6], %6 {strides = array<i32>} : memref<64x96xf32, #tpu.memory_space<vmem>>, vector<64x96xf32>,
    return
  }
  func.func @transform_0(%arg0: i32) -> (i32, i32) {
    %c0_i32 = arith.constant 0 : i32
    %c0_i32_0 = arith.constant 0 : i32
    return %arg0, %c0_i32 : i32, i32
  }
  func.func @transform_1(%arg0: i32) -> (i32, i32) {
    %c0_i32 = arith.constant 0 : i32
    %c0_i32_0 = arith.constant 0 : i32
    %c0_i32_1 = arith.constant 0 : i32
    return %c0_i32, %c0_i32_0 : i32, i32
  }
  func.func @transform_2(%arg0: i32) -> (i32, i32) {
    %c0_i32 = arith.constant 0 : i32
    %c0_i32_0 = arith.constant 0 : i32
    %c0_i32_1 = arith.constant 0 : i32
    return %c0_i32, %c0_i32_0 : i32, i32
  }
  func.func @transform_3(%arg0: i32) -> (i32, i32) {
    %c0_i32 = arith.constant 0 : i32
    %c0_i32_0 = arith.constant 0 : i32
    return %arg0, %c0_i32 : i32, i32
  }
}

</mosaic_0001>

<bundles_post_ra>
// kernel: tpu_custom_call.1
= control target key start
LH: loop header
LB: loop body
LE: loop exit
PB: predicated region body
PF: predicated region fallthrough
CT: control target
= control target key end

     0   :  { %vm51_vm0 = vcmask 261120   ;;  %s292_s0 = inlined_call_operand.vmem [shape: f32[64,32], index: 0, kind: input, shape index: {}]   ;;  %s293_s1 = inlined_call_operand.vmem [shape: bf16[32,96], index: 1, kind: input, shape index: {}]   ;;  %s294_s2 = inlined_call_operand.vmem [shape: f32[1,96], index: 2, kind: input, shape index: {}]   ;;  %s295_s3 = inlined_call_operand.hbm [shape: f32[64,96], index: 3, kind: output, shape index: {}]  }
   0x1   :  { %v186_v0 = vld [vmem:[%s293_s1] sm:$0xff]   ;;  %v187_v1 = vld [vmem:[%s293_s1 + $0x8] sm:$0xff]   ;;  %v18_v7 = vld [vmem:[%s292_s0 + $0x10] sm:$0xff] }
   0x2   :  { %167 = vmatprep.subr.bf16.mxu0 %v186_v0  ;;  %179 = vmatprep.subr.bf16.mxu1 %v186_v0  ;;  %v16_v2 = vld [vmem:[%s292_s0] sm:$0xff]  ;;  %v17_v3 = vld [vmem:[%s292_s0 + $0x8] sm:$0xff]  ;;  %v19_v8 = vld [vmem:[%s292_s0 + $0x18] sm:$0xff] }
   0x3   :  { %v20_v4 = vld [vmem:[%s292_s0 + $0x20] sm:$0xff]  ;;  %168 = vmatpush3.bf16.msra.mxu0 %v186_v0  ;;  %181 = vmatpush3.bf16.msra.mxu1 %v186_v0  ;;  %v24_v5 = vpack.c.bf16 %v17_v3, %v16_v2  ;;  %v21_v6 = vld [vmem:[%s292_s0 + $0x28] sm:$0xff]  ;;  %v22_v10 = vld [vmem:[%s292_s0 + $0x30] sm:$0xff] }
   0x4   :  { %169 = vmatprep.subr.bf16.mxu0 %v187_v1  ;;  %180 = vmatprep.subr.bf16.mxu1 %v187_v1  ;;  %v26_v9 = vpack.c.bf16 %v21_v6, %v20_v4  ;;  %v23_v11 = vld [vmem:[%s292_s0 + $0x38] sm:$0xff] }
   0x5   :  { %8 = vsyncpa [#allocation3], 0  ;;  %171 = vmatprep.mubr.msk.bf16.mxu0 %vm51_vm0, %v24_v5  ;;  %v25_v12 = vpack.c.bf16 %v19_v8, %v18_v7  ;;  %v27_v13 = vpack.c.bf16 %v23_v11, %v22_v10  ;;  %v154_v14 = vld [vmem:[%s294_s2] ss:$0 sm:$0xff]  ;;  %vm129_vm1 = vcmask 785408   ;;  %s212_s0 = smov [#allocation2]  }
   0x6   :  { %175 = vmatprep.mubr.msk.bf16.mxu1 %vm51_vm0, %v26_v9  ;;  %s143_s6 = sshll.u32 %s212_s0, 4  ;;  %s144_s6 = int_to_ptr.vmem [resolvable:$true] %s143_s6 }
   0x7   :  { %170 = vmatpush3.bf16.msra.mxu0 %v187_v1  ;;  %182 = vmatpush3.bf16.msra.mxu1 %v187_v1  ;;  %s188_s2 = scalar_lea.vmem %s144_s6, 1024  ;;  %p193_p1 = scmp.lt.s32.totalorder %s144_s6, %s144_s6 }
   0x8   :  { %p189_p0 = scmp.ne.s32.totalorder %s144_s6, %s188_s2  ;;  %p194_p2 = scmp.lt.s32.totalorder %s188_s2, %s188_s2 }
   0xa   :  { %172 = vmatmul.mubr.msk.bf16.vlgmr.msra.gmra.mrb[0].mxu0 %vm51_vm0, %v25_v12  ;;  %176 = vmatmul.mubr.msk.bf16.vlgmr.msra.gmra.mrb[0].mxu1 %vm51_vm0, %v27_v13  ;;  %p195_p3 = por %p194_p2, %p193_p1 }
   0xc   :  { %p196_p4 = pnand %p195_p3, %p189_p0 }
  0xdd   :  { %v173_v15 = vpop.f32.mrb[0].mxu0  ;;  %v177_v16 = vpop.f32.mrb[0].mxu1 }
  0xde   :  { %v107_v17 = vadd.f32 %v173_v15, %v154_v14  ;;  %v123_v18 = vadd.f32 %v177_v16, %v154_v14  ;;  %v98_v19 = vpop.f32.mrb[1].mxu0  ;;  %v114_v20 = vpop.f32.mrb[1].mxu1 }
  0xdf   :  { %v99_v21 = vadd.f32 %v154_v14, %v98_v19  ;;  %v115_v22 = vadd.f32 %v154_v14, %v114_v20  ;;  %v174_v23 = vpop.f32.mrb[2].mxu0  ;;  %v178_v24 = vpop.f32.mrb[2].mxu1 }
  0xe0   :  { %132 = vst.msk [vmem:[#allocation2 + $0x10] sm:$0xff] %vm129_vm1, %v107_v17  ;;  %136 = vst.msk [vmem:[#allocation2 + $0x30] sm:$0xff] %vm129_vm1, %v123_v18  ;;  %v110_v25 = vadd.f32 %v174_v23, %v154_v14  ;;  %v126_v26 = vadd.f32 %v178_v24, %v154_v14  ;;  %v101_v27 = vpop.f32.mrb[3].mxu0  ;;  %v117_v28 = vpop.f32.mrb[3].mxu1 }
  0xe1   :  { %130 = vst.msk [vmem:[#allocation2] sm:$0xff] %vm129_vm1, %v99_v21  ;;  %134 = vst.msk [vmem:[#allocation2 + $0x20] sm:$0xff] %vm129_vm1, %v115_v22  ;;  %v102_v29 = vadd.f32 %v154_v14, %v101_v27  ;;  %v118_v30 = vadd.f32 %v154_v14, %v117_v28 }
  0xe2   :  { %133 = vst.msk [vmem:[#allocation2 + $0x18] sm:$0xff] %vm129_vm1, %v110_v25  ;;  %137 = vst.msk [vmem:[#allocation2 + $0x38] sm:$0xff] %vm129_vm1, %v126_v26 }
  0xe3   :  { %131 = vst.msk [vmem:[#allocation2 + $0x8] sm:$0xff] %vm129_vm1, %v102_v29  ;;  %135 = vst.msk [vmem:[#allocation2 + $0x28] sm:$0xff] %vm129_vm1, %v118_v30 }
  0xe4   :  { %199 = shalt.err (!%p196_p4)
}
  0xe5   :  { %s200_s9 = scalar_lea.hbm %s295_s3, 1024 }
  0xe6   :  { %p201_p5 = scmp.ne.s32.totalorder %s295_s3, %s200_s9  ;;  %p204_p6 = scmp.lt.u32.totalorder %s200_s9, %s295_s3 }
  0xe8   :  { %p206_p7 = pnand %p204_p6, %p201_p5 }
  0xea   :  { %209 = shalt.err (!%p206_p7)
}
  0xeb   :  { %s213_s14 = smov 128   ;;  %s214_s15 = smov 8  }
  0xec   :  { %149 = dma.vmem_to_hbm [thread:$0]  %s144_s6, 1024, %s295_s3, [#allocation3], %s213_s14, %s213_s14, %s214_s15  }
  0xed   :  { %210 = dma.done.wait [#allocation3], 1024  }
  0xee   :  { %211 = vsyncadd [#allocation3], 4294966272 }
  0xef   :  { %153 = vsyncpa [#allocation3], 1 }

</bundles_post_ra>
